<compile_context>
chip_gen: v6e
topology: v6e:2x2x1
jax: 0.10.0
libtpu: 0.0.40
codegen_flags: <defaults>
</compile_context>

<pallas_src>
import math
import functools

import jax
import jax.numpy as jnp
from jax.experimental import pallas as pl
from jax.experimental.pallas import tpu as pltpu

N_LAYERS = 3
LOG_2PI = math.log(2.0 * math.pi)


def _round_up(a, b):
    return ((a + b - 1) // b) * b


def _choose_tb(n, tb_max=2048, target_steps=8):
    """Lane tile: multiple of 128, <= tb_max, aiming for ~target_steps grid steps."""
    tb_max = max(128, (tb_max // 128) * 128)
    n128 = _round_up(max(n, 1), 128)
    tb = _round_up(max(n128 // target_steps, 128), 128)
    return min(tb, tb_max, n128)


def _realnvp_kernel(x_ref, W1p_ref, b1p_ref, W2p_ref, b2p_ref, *out_refs,
                    n_layers, half, emit_z, op_dtype):
    """Whole-flow forward on one batch tile (batch on the lane axis).

    x_ref : (2*half, TB)        merged transposed latent tile
    W1p   : (L, 2*hid, half)    = [sW1^T ; tW1^T]       (fused first matmul)
    b1p   : (L, 2*hid, 1)
    W2p   : (L, 2*half, 2*hid)  = blockdiag(sW2, tW2)^T (fused second matmul)
    b2p   : (L, 2*half, 1)
    outputs: [z_ref (2*half, TB) if emit_z], ld_ref (1, TB), lp_ref (1, TB)
    """
    if emit_z:
        z_ref, ld_ref, lp_ref = out_refs
    else:
        ld_ref, lp_ref = out_refs

    # Carries stay f32; half split is a static sublane-aligned slice (half % 8 == 0).
    x0 = x_ref[:half, :].astype(jnp.float32)
    x1 = x_ref[half:, :].astype(jnp.float32)
    s_acc = jnp.zeros_like(x0)

    for l in range(n_layers):
        if l % 2 == 1:
            # parity swap = pure Python variable swap, zero data movement
            x0, x1 = x1, x0

        # fused first layer of both MLPs: (2*hid, half) @ (half, TB) -> (2*hid, TB)
        h = jnp.maximum(
            jnp.dot(W1p_ref[l], x0.astype(op_dtype),
                    preferred_element_type=jnp.float32) + b1p_ref[l], 0.0)

        # fused (block-diagonal) second layer: (2*half, 2*hid) @ (2*hid, TB)
        out = jnp.dot(W2p_ref[l], h.astype(op_dtype),
                      preferred_element_type=jnp.float32) + b2p_ref[l]

        s = jnp.tanh(out[:half, :])        # sublane-aligned static slices
        t = out[half:, :]

        x1 = x1 * jnp.exp(s) + t
        s_acc = s_acc + s

    # single cross-sublane reductions at the end; outputs are lane-dense (1, TB).
    log_det = jnp.sum(s_acc, axis=0, keepdims=True)
    # fused StandardNormal base log_prob; padded batch lanes are zero and only pass
    # through bounded ops (tanh/exp) so there is no NaN risk on padding.
    zsq = jnp.sum(x0 * x0 + x1 * x1, axis=0, keepdims=True)
    ld_ref[...] = log_det
    lp_ref[...] = -0.5 * (LOG_2PI * (2 * half) + zsq) + log_det

    if emit_z:
        z_ref[:half, :] = x0.astype(z_ref.dtype)
        z_ref[half:, :] = x1.astype(z_ref.dtype)


def _pack_params(params, op_dtype):
    """Tiny one-time wrapper-side weight packing (plain XLA)."""
    L, half, hid = params["sW1"].shape
    W1p = jnp.concatenate([params["sW1"], params["tW1"]], axis=2).transpose(0, 2, 1)   # (L, 2*hid, half)
    b1p = jnp.concatenate([params["sb1"], params["tb1"]], axis=2).transpose(0, 2, 1)   # (L, 2*hid, 1)
    zblk = jnp.zeros((L, hid, half), jnp.float32)
    W2blk = jnp.concatenate(
        [jnp.concatenate([params["sW2"], zblk], axis=2),
         jnp.concatenate([zblk, params["tW2"]], axis=2)], axis=1)                      # (L, 2*hid, 2*half)
    W2p = W2blk.transpose(0, 2, 1)                                                     # (L, 2*half, 2*hid)
    b2p = jnp.concatenate([params["sb2"], params["tb2"]], axis=2).transpose(0, 2, 1)   # (L, 2*half, 1)
    return (W1p.astype(op_dtype), b1p.astype(jnp.float32),
            W2p.astype(op_dtype), b2p.astype(jnp.float32))


def _run(x, params, *, emit_z, tb_max=2048, op_dtype=jnp.float32):
    n, d = x.shape
    half = d // 2
    assert d == 2 * half and half % 8 == 0, "hid_dim must be even and hid_dim/2 % 8 == 0"
    L = params["sW1"].shape[0]

    W1p, b1p, W2p, b2p = _pack_params(params, op_dtype)

    tb = _choose_tb(n, tb_max)
    assert tb % 128 == 0, "lane tile must be a multiple of 128"
    n_pad = _round_up(n, tb)

    # batch -> lane axis: single transpose + zero-pad in the wrapper.
    xt = jnp.pad(x.astype(jnp.float32).T, ((0, 0), (0, n_pad - n))).astype(op_dtype)   # (d, n_pad)

    grid = (n_pad // tb,)
    act_spec = pl.BlockSpec((d, tb), lambda i: (0, i))
    row_spec = pl.BlockSpec((1, tb), lambda i: (0, i))

    def w_spec(a):
        # full array, constant block index -> stays resident in VMEM across grid steps
        return pl.BlockSpec(a.shape, lambda i: (0, 0, 0))

    out_shape = []
    out_specs = []
    if emit_z:
        out_shape.append(jax.ShapeDtypeStruct((d, n_pad), jnp.float32))
        out_specs.append(act_spec)
    out_shape += [jax.ShapeDtypeStruct((1, n_pad), jnp.float32),   # log_det
                  jax.ShapeDtypeStruct((1, n_pad), jnp.float32)]   # log_prob
    out_specs += [row_spec, row_spec]

    outs = pl.pallas_call(
        functools.partial(_realnvp_kernel, n_layers=L, half=half,
                          emit_z=emit_z, op_dtype=op_dtype),
        out_shape=tuple(out_shape),
        grid_spec=pltpu.PrefetchScalarGridSpec(
            num_scalar_prefetch=0,
            grid=grid,
            in_specs=[act_spec, w_spec(W1p), w_spec(b1p), w_spec(W2p), w_spec(b2p)],
            out_specs=tuple(out_specs),
        ),
        compiler_params=pltpu.CompilerParams(
            dimension_semantics=("parallel",),          # shard batch tiles across TCs (v7x)
            vmem_limit_bytes=32 * 1024 * 1024,          # footprint is tiny; fits all gens
        ),
    )(xt, W1p, b1p, W2p, b2p)

    if emit_z:
        zt, ldt, lpt = outs
        z = zt[:, :n].T                                  # single transpose back, no concat
        return z, ldt[0, :n], lpt[0, :n]
    ldt, lpt = outs
    return None, ldt[0, :n], lpt[0, :n]


def realnvp_forward(x, params, *, tb_max=2048, op_dtype=jnp.float32):
    """RealNPV.forward: x -> (z, log_det)."""
    z, log_det, _ = _run(x, params, emit_z=True, tb_max=tb_max, op_dtype=op_dtype)
    return z, log_det


def realnvp_log_prob(x, params, *, tb_max=2048, op_dtype=jnp.float32):
    """RealNPV.log_prob fast path: skips z writeback + output transpose entirely."""
    _, _, log_px = _run(x, params, emit_z=False, tb_max=tb_max, op_dtype=op_dtype)
    return log_px


def init_params(key, hid_dim, n_layers=N_LAYERS):
    """Deterministic synthetic parameters for the coupling MLPs (stacked over layers)."""
    half = hid_dim // 2
    hid = hid_dim
    ks = jax.random.split(key, 4)
    scale = 0.1
    return {
        "sW1": scale * jax.random.normal(ks[0], (n_layers, half, hid), jnp.float32),
        "sb1": jnp.zeros((n_layers, 1, hid), jnp.float32),
        "sW2": scale * jax.random.normal(ks[1], (n_layers, hid, half), jnp.float32),
        "sb2": jnp.zeros((n_layers, 1, half), jnp.float32),
        "tW1": scale * jax.random.normal(ks[2], (n_layers, half, hid), jnp.float32),
        "tb1": jnp.zeros((n_layers, 1, hid), jnp.float32),
        "tW2": scale * jax.random.normal(ks[3], (n_layers, hid, half), jnp.float32),
        "tb2": jnp.zeros((n_layers, 1, half), jnp.float32),
    }


def realnvp_forward_ref(x, params):
    """Pure-JAX reference of the same forward pass (for correctness check)."""
    z = x.astype(jnp.float32)
    n, d = z.shape
    half = d // 2
    log_det = jnp.zeros((n,), jnp.float32)
    for i in range(N_LAYERS):
        if i % 2:
            z = jnp.concatenate([z[:, half:], z[:, :half]], axis=1)
        x0, x1 = z[:, :half], z[:, half:]
        h_s = jax.nn.relu(x0 @ params["sW1"][i] + params["sb1"][i])
        s = jnp.tanh(h_s @ params["sW2"][i] + params["sb2"][i])
        h_t = jax.nn.relu(x0 @ params["tW1"][i] + params["tb1"][i])
        t = h_t @ params["tW2"][i] + params["tb2"][i]
        z = jnp.concatenate([x0, x1 * jnp.exp(s) + t], axis=1)
        log_det = log_det + jnp.sum(s, axis=1)
    return z, log_det


if __name__ == "__main__":
    key = jax.random.PRNGKey(0)
    k_x, k_p = jax.random.split(key)

    batch = 512
    hid_dim = 32  # latent dimension of the flow prior

    x = jax.random.normal(k_x, (batch, hid_dim), jnp.float32)
    params = init_params(k_p, hid_dim)

    # f32 forward path; adaptive tb gives grid=(4,) here -> exercises pipelining.
    z, log_det = realnvp_forward(x, params)
    jax.block_until_ready((z, log_det))

    z_ref, ld_expected = realnvp_forward_ref(x, params)
    assert z.shape == (batch, hid_dim) and log_det.shape == (batch,)
    assert jnp.allclose(z, z_ref, atol=1e-4, rtol=1e-4)
    assert jnp.allclose(log_det, ld_expected, atol=1e-4, rtol=1e-4)

    # Fused log_prob fast path (no z writeback, no output transpose).
    log_px = realnvp_log_prob(x, params)
    jax.block_until_ready(log_px)
    log_px_expected = (-0.5 * (math.log(2.0 * math.pi) * hid_dim
                               + jnp.sum(z_ref * z_ref, axis=1)) + ld_expected)
    assert log_px.shape == (batch,)
    assert jnp.allclose(log_px, log_px_expected, atol=1e-4, rtol=1e-4)

    # bf16 MXU-operand path (HBM/VMEM traffic savings on v6e/v7x; f32 accumulation).
    log_px_bf16 = realnvp_log_prob(x, params, op_dtype=jnp.bfloat16)
    jax.block_until_ready(log_px_bf16)
    assert jnp.allclose(log_px_bf16, log_px_expected, atol=1e-1, rtol=1e-1)

    print("KERNEL_OK")
</pallas_src>

<mosaic_0001>
module attributes {stable_mosaic.version = 11 : i64} {
  func.func @_realnvp_kernel(%arg0: i32, %arg1: memref<32x128xf32, #tpu.memory_space<vmem>>, %arg2: memref<3x64x16xf32, #tpu.memory_space<vmem>>, %arg3: memref<3x64x1xf32, #tpu.memory_space<vmem>>, %arg4: memref<3x32x64xf32, #tpu.memory_space<vmem>>, %arg5: memref<3x32x1xf32, #tpu.memory_space<vmem>>, %arg6: memref<32x128xf32, #tpu.memory_space<vmem>>, %arg7: memref<1x128xf32, #tpu.memory_space<vmem>>, %arg8: memref<1x128xf32, #tpu.memory_space<vmem>>) attributes {dimension_semantics = [#tpu.dimension_semantics<parallel>], iteration_bounds = array<i64: 4>, scalar_prefetch = 0 : i64, scratch_operands = 0 : i64, tpu.core_type = #tpu.core_type<tc>, window_params = [{transform_indices = @transform_0, window_bounds = array<i64: 32, 128>}, {pipeline_mode = #tpu.pipeline_mode<synchronous>, transform_indices = @transform_1, window_bounds = array<i64: 3, 64, 16>}, {pipeline_mode = #tpu.pipeline_mode<synchronous>, transform_indices = @transform_2, window_bounds = array<i64: 3, 64, 1>}, {pipeline_mode = #tpu.pipeline_mode<synchronous>, transform_indices = @transform_3, window_bounds = array<i64: 3, 32, 64>}, {pipeline_mode = #tpu.pipeline_mode<synchronous>, transform_indices = @transform_4, window_bounds = array<i64: 3, 32, 1>}, {transform_indices = @transform_5, window_bounds = array<i64: 32, 128>}, {transform_indices = @transform_6, window_bounds = array<i64: 1, 128>}, {transform_indices = @transform_7, window_bounds = array<i64: 1, 128>}]} {
    %c0 = arith.constant 0 : index
    %c0_0 = arith.constant 0 : index
    %0 = vector.load %arg1[%c0, %c0_0] : memref<32x128xf32, #tpu.memory_space<vmem>>, vector<16x128xf32>
    %c16 = arith.constant 16 : index
    %c0_1 = arith.constant 0 : index
    %1 = vector.load %arg1[%c16, %c0_1] : memref<32x128xf32, #tpu.memory_space<vmem>>, vector<16x128xf32>
    %cst = arith.constant 0.000000e+00 : f32
    %2 = vector.broadcast %cst : f32 to vector<16x128xf32>
    %c0_2 = arith.constant 0 : index
    %c0_3 = arith.constant 0 : index
    %c0_4 = arith.constant 0 : index
    %3 = vector.load %arg2[%c0_2, %c0_3, %c0_4] : memref<3x64x16xf32, #tpu.memory_space<vmem>>, vector<1x64x16xf32>
    %4 = vector.shape_cast %3 : vector<1x64x16xf32> to vector<64x16xf32>
    %cst_5 = arith.constant dense<0.000000e+00> : vector<64x128xf32>
    %5 = tpu.matmul %4, %0, %cst_5 {dimension_numbers = #tpu.dot_dimension_numbers<[1], [0], [0], [1], [0, 0, 1, 1], [], []>} : vector<64x16xf32>, vector<16x128xf32>, vector<64x128xf32> -> vector<64x128xf32>
    %c0_6 = arith.constant 0 : index
    %c0_7 = arith.constant 0 : index
    %c0_8 = arith.constant 0 : index
    %6 = vector.load %arg3[%c0_6, %c0_7, %c0_8] : memref<3x64x1xf32, #tpu.memory_space<vmem>>, vector<1x64x1xf32>
    %7 = vector.shape_cast %6 : vector<1x64x1xf32> to vector<64x1xf32>
    %8 = vector.broadcast %7 : vector<64x1xf32> to vector<64x128xf32>
    %9 = arith.addf %5, %8 : vector<64x128xf32>
    %cst_9 = arith.constant 0.000000e+00 : f32
    %10 = vector.broadcast %cst_9 : f32 to vector<64x128xf32>
    %11 = arith.maximumf %9, %10 : vector<64x128xf32>
    %c0_10 = arith.constant 0 : index
    %c0_11 = arith.constant 0 : index
    %c0_12 = arith.constant 0 : index
    %12 = vector.load %arg4[%c0_10, %c0_11, %c0_12] : memref<3x32x64xf32, #tpu.memory_space<vmem>>, vector<1x32x64xf32>
    %13 = vector.shape_cast %12 : vector<1x32x64xf32> to vector<32x64xf32>
    %cst_13 = arith.constant dense<0.000000e+00> : vector<32x128xf32>
    %14 = tpu.matmul %13, %11, %cst_13 {dimension_numbers = #tpu.dot_dimension_numbers<[1], [0], [0], [1], [0, 0, 1, 1], [], []>} : vector<32x64xf32>, vector<64x128xf32>, vector<32x128xf32> -> vector<32x128xf32>
    %c0_14 = arith.constant 0 : index
    %c0_15 = arith.constant 0 : index
    %c0_16 = arith.constant 0 : index
    %15 = vector.load %arg5[%c0_14, %c0_15, %c0_16] : memref<3x32x1xf32, #tpu.memory_space<vmem>>, vector<1x32x1xf32>
    %16 = vector.shape_cast %15 : vector<1x32x1xf32> to vector<32x1xf32>
    %17 = vector.broadcast %16 : vector<32x1xf32> to vector<32x128xf32>
    %18 = arith.addf %14, %17 : vector<32x128xf32>
    %19 = vector.extract_strided_slice %18 {offsets = [0, 0], sizes = [16, 128], strides = [1, 1]} : vector<32x128xf32> to vector<16x128xf32>
    %20 = math.tanh %19 : vector<16x128xf32>
    %21 = vector.extract_strided_slice %18 {offsets = [16, 0], sizes = [16, 128], strides = [1, 1]} : vector<32x128xf32> to vector<16x128xf32>
    %22 = math.exp %20 : vector<16x128xf32>
    %23 = arith.mulf %1, %22 : vector<16x128xf32>
    %24 = arith.addf %23, %21 : vector<16x128xf32>
    %25 = arith.addf %2, %20 : vector<16x128xf32>
    %c1 = arith.constant 1 : index
    %c0_17 = arith.constant 0 : index
    %c0_18 = arith.constant 0 : index
    %26 = vector.load %arg2[%c1, %c0_17, %c0_18] : memref<3x64x16xf32, #tpu.memory_space<vmem>>, vector<1x64x16xf32>
    %27 = vector.shape_cast %26 : vector<1x64x16xf32> to vector<64x16xf32>
    %cst_19 = arith.constant dense<0.000000e+00> : vector<64x128xf32>
    %28 = tpu.matmul %27, %24, %cst_19 {dimension_numbers = #tpu.dot_dimension_numbers<[1], [0], [0], [1], [0, 0, 1, 1], [], []>} : vector<64x16xf32>, vector<16x128xf32>, vector<64x128xf32> -> vector<64x128xf32>
    %c1_20 = arith.constant 1 : index
    %c0_21 = arith.constant 0 : index
    %c0_22 = arith.constant 0 : index
    %29 = vector.load %arg3[%c1_20, %c0_21, %c0_22] : memref<3x64x1xf32, #tpu.memory_space<vmem>>, vector<1x64x1xf32>
    %30 = vector.shape_cast %29 : vector<1x64x1xf32> to vector<64x1xf32>
    %31 = vector.broadcast %30 : vector<64x1xf32> to vector<64x128xf32>
    %32 = arith.addf %28, %31 : vector<64x128xf32>
    %cst_23 = arith.constant 0.000000e+00 : f32
    %33 = vector.broadcast %cst_23 : f32 to vector<64x128xf32>
    %34 = arith.maximumf %32, %33 : vector<64x128xf32>
    %c1_24 = arith.constant 1 : index
    %c0_25 = arith.constant 0 : index
    %c0_26 = arith.constant 0 : index
    %35 = vector.load %arg4[%c1_24, %c0_25, %c0_26] : memref<3x32x64xf32, #tpu.memory_space<vmem>>, vector<1x32x64xf32>
    %36 = vector.shape_cast %35 : vector<1x32x64xf32> to vector<32x64xf32>
    %cst_27 = arith.constant dense<0.000000e+00> : vector<32x128xf32>
    %37 = tpu.matmul %36, %34, %cst_27 {dimension_numbers = #tpu.dot_dimension_numbers<[1], [0], [0], [1], [0, 0, 1, 1], [], []>} : vector<32x64xf32>, vector<64x128xf32>, vector<32x128xf32> -> vector<32x128xf32>
    %c1_28 = arith.constant 1 : index
    %c0_29 = arith.constant 0 : index
    %c0_30 = arith.constant 0 : index
    %38 = vector.load %arg5[%c1_28, %c0_29, %c0_30] : memref<3x32x1xf32, #tpu.memory_space<vmem>>, vector<1x32x1xf32>
    %39 = vector.shape_cast %38 : vector<1x32x1xf32> to vector<32x1xf32>
    %40 = vector.broadcast %39 : vector<32x1xf32> to vector<32x128xf32>
    %41 = arith.addf %37, %40 : vector<32x128xf32>
    %42 = vector.extract_strided_slice %41 {offsets = [0, 0], sizes = [16, 128], strides = [1, 1]} : vector<32x128xf32> to vector<16x128xf32>
    %43 = math.tanh %42 : vector<16x128xf32>
    %44 = vector.extract_strided_slice %41 {offsets = [16, 0], sizes = [16, 128], strides = [1, 1]} : vector<32x128xf32> to vector<16x128xf32>
    %45 = math.exp %43 : vector<16x128xf32>
    %46 = arith.mulf %0, %45 : vector<16x128xf32>
    %47 = arith.addf %46, %44 : vector<16x128xf32>
    %48 = arith.addf %25, %43 : vector<16x128xf32>
    %c2 = arith.constant 2 : index
    %c0_31 = arith.constant 0 : index
    %c0_32 = arith.constant 0 : index
    %49 = vector.load %arg2[%c2, %c0_31, %c0_32] : memref<3x64x16xf32, #tpu.memory_space<vmem>>, vector<1x64x16xf32>
    %50 = vector.shape_cast %49 : vector<1x64x16xf32> to vector<64x16xf32>
    %cst_33 = arith.constant dense<0.000000e+00> : vector<64x128xf32>
    %51 = tpu.matmul %50, %24, %cst_33 {dimension_numbers = #tpu.dot_dimension_numbers<[1], [0], [0], [1], [0, 0, 1, 1], [], []>} : vector<64x16xf32>, vector<16x128xf32>, vector<64x128xf32> -> vector<64x128xf32>
    %c2_34 = arith.constant 2 : index
    %c0_35 = arith.constant 0 : index
    %c0_36 = arith.constant 0 : index
    %52 = vector.load %arg3[%c2_34, %c0_35, %c0_36] : memref<3x64x1xf32, #tpu.memory_space<vmem>>, vector<1x64x1xf32>
    %53 = vector.shape_cast %52 : vector<1x64x1xf32> to vector<64x1xf32>
    %54 = vector.broadcast %53 : vector<64x1xf32> to vector<64x128xf32>
    %55 = arith.addf %51, %54 : vector<64x128xf32>
    %cst_37 = arith.constant 0.000000e+00 : f32
    %56 = vector.broadcast %cst_37 : f32 to vector<64x128xf32>
    %57 = arith.maximumf %55, %56 : vector<64x128xf32>
    %c2_38 = arith.constant 2 : index
    %c0_39 = arith.constant 0 : index
    %c0_40 = arith.constant 0 : index
    %58 = vector.load %arg4[%c2_38, %c0_39, %c0_40] : memref<3x32x64xf32, #tpu.memory_space<vmem>>, vector<1x32x64xf32>
    %59 = vector.shape_cast %58 : vector<1x32x64xf32> to vector<32x64xf32>
    %cst_41 = arith.constant dense<0.000000e+00> : vector<32x128xf32>
    %60 = tpu.matmul %59, %57, %cst_41 {dimension_numbers = #tpu.dot_dimension_numbers<[1], [0], [0], [1], [0, 0, 1, 1], [], []>} : vector<32x64xf32>, vector<64x128xf32>, vector<32x128xf32> -> vector<32x128xf32>
    %c2_42 = arith.constant 2 : index
    %c0_43 = arith.constant 0 : index
    %c0_44 = arith.constant 0 : index
    %61 = vector.load %arg5[%c2_42, %c0_43, %c0_44] : memref<3x32x1xf32, #tpu.memory_space<vmem>>, vector<1x32x1xf32>
    %62 = vector.shape_cast %61 : vector<1x32x1xf32> to vector<32x1xf32>
    %63 = vector.broadcast %62 : vector<32x1xf32> to vector<32x128xf32>
    %64 = arith.addf %60, %63 : vector<32x128xf32>
    %65 = vector.extract_strided_slice %64 {offsets = [0, 0], sizes = [16, 128], strides = [1, 1]} : vector<32x128xf32> to vector<16x128xf32>
    %66 = math.tanh %65 : vector<16x128xf32>
    %67 = vector.extract_strided_slice %64 {offsets = [16, 0], sizes = [16, 128], strides = [1, 1]} : vector<32x128xf32> to vector<16x128xf32>
    %68 = math.exp %66 : vector<16x128xf32>
    %69 = arith.mulf %47, %68 : vector<16x128xf32>
    %70 = arith.addf %69, %67 : vector<16x128xf32>
    %71 = arith.addf %48, %66 : vector<16x128xf32>
    %cst_45 = arith.constant dense<0.000000e+00> : vector<128xf32>
    %72 = vector.multi_reduction <add>, %71, %cst_45 [0] : vector<16x128xf32> to vector<128xf32>
    %73 = vector.shape_cast %72 : vector<128xf32> to vector<1x128xf32>
    %74 = arith.mulf %24, %24 : vector<16x128xf32>
    %75 = arith.mulf %70, %70 : vector<16x128xf32>
    %76 = arith.addf %74, %75 : vector<16x128xf32>
    %cst_46 = arith.constant dense<0.000000e+00> : vector<128xf32>
    %77 = vector.multi_reduction <add>, %76, %cst_46 [0] : vector<16x128xf32> to vector<128xf32>
    %78 = vector.shape_cast %77 : vector<128xf32> to vector<1x128xf32>
    %c0_47 = arith.constant 0 : index
    %c0_48 = arith.constant 0 : index
    %79 = vector.load %arg7[%c0_47, %c0_48] : memref<1x128xf32, #tpu.memory_space<vmem>>, vector<1x128xf32>
    tpu.vector_store %arg7[%c0_47, %c0_48], %73 {strides = array<i32>} : memref<1x128xf32, #tpu.memory_space<vmem>>, vector<1x128xf32>,
    %cst_49 = arith.constant 58.8120651 : f32
    %80 = vector.broadcast %cst_49 : f32 to vector<1x128xf32>
    %81 = arith.addf %80, %78 : vector<1x128xf32>
    %cst_50 = arith.constant -5.000000e-01 : f32
    %82 = vector.broadcast %cst_50 : f32 to vector<1x128xf32>
    %83 = arith.mulf %82, %81 : vector<1x128xf32>
    %84 = arith.addf %83, %73 : vector<1x128xf32>
    %c0_51 = arith.constant 0 : index
    %c0_52 = arith.constant 0 : index
    %85 = vector.load %arg8[%c0_51, %c0_52] : memref<1x128xf32, #tpu.memory_space<vmem>>, vector<1x128xf32>
    tpu.vector_store %arg8[%c0_51, %c0_52], %84 {strides = array<i32>} : memref<1x128xf32, #tpu.memory_space<vmem>>, vector<1x128xf32>,
    %c0_53 = arith.constant 0 : index
    %c0_54 = arith.constant 0 : index
    %86 = vector.load %arg6[%c0_53, %c0_54] : memref<32x128xf32, #tpu.memory_space<vmem>>, vector<16x128xf32>
    tpu.vector_store %arg6[%c0_53, %c0_54], %24 {strides = array<i32>} : memref<32x128xf32, #tpu.memory_space<vmem>>, vector<16x128xf32>,
    %c16_55 = arith.constant 16 : index
    %c0_56 = arith.constant 0 : index
    %87 = vector.load %arg6[%c16_55, %c0_56] : memref<32x128xf32, #tpu.memory_space<vmem>>, vector<16x128xf32>
    tpu.vector_store %arg6[%c16_55, %c0_56], %70 {strides = array<i32>} : memref<32x128xf32, #tpu.memory_space<vmem>>, vector<16x128xf32>,
    return
  }
  func.func @transform_0(%arg0: i32) -> (i32, i32) {
    %c0_i32 = arith.constant 0 : i32
    %c0_i32_0 = arith.constant 0 : i32
    return %c0_i32, %arg0 : i32, i32
  }
  func.func @transform_1(%arg0: i32) -> (i32, i32, i32) {
    %c0_i32 = arith.constant 0 : i32
    %c0_i32_0 = arith.constant 0 : i32
    %c0_i32_1 = arith.constant 0 : i32
    %c0_i32_2 = arith.constant 0 : i32
    return %c0_i32, %c0_i32_0, %c0_i32_1 : i32, i32, i32
  }
  func.func @transform_2(%arg0: i32) -> (i32, i32, i32) {
    %c0_i32 = arith.constant 0 : i32
    %c0_i32_0 = arith.constant 0 : i32
    %c0_i32_1 = arith.constant 0 : i32
    %c0_i32_2 = arith.constant 0 : i32
    return %c0_i32, %c0_i32_0, %c0_i32_1 : i32, i32, i32
  }
  func.func @transform_3(%arg0: i32) -> (i32, i32, i32) {
    %c0_i32 = arith.constant 0 : i32
    %c0_i32_0 = arith.constant 0 : i32
    %c0_i32_1 = arith.constant 0 : i32
    %c0_i32_2 = arith.constant 0 : i32
    return %c0_i32, %c0_i32_0, %c0_i32_1 : i32, i32, i32
  }
  func.func @transform_4(%arg0: i32) -> (i32, i32, i32) {
    %c0_i32 = arith.constant 0 : i32
    %c0_i32_0 = arith.constant 0 : i32
    %c0_i32_1 = arith.constant 0 : i32
    %c0_i32_2 = arith.constant 0 : i32
    return %c0_i32, %c0_i32_0, %c0_i32_1 : i32, i32, i32
  }
  func.func @transform_5(%arg0: i32) -> (i32, i32) {
    %c0_i32 = arith.constant 0 : i32
    %c0_i32_0 = arith.constant 0 : i32
    return %c0_i32, %arg0 : i32, i32
  }
  func.func @transform_6(%arg0: i32) -> (i32, i32) {
    %c0_i32 = arith.constant 0 : i32
    %c0_i32_0 = arith.constant 0 : i32
    return %c0_i32, %arg0 : i32, i32
  }
  func.func @transform_7(%arg0: i32) -> (i32, i32) {
    %c0_i32 = arith.constant 0 : i32
    %c0_i32_0 = arith.constant 0 : i32
    return %c0_i32, %arg0 : i32, i32
  }
}

</mosaic_0001>

<bundles_post_ra>
// kernel: tpu_custom_call.1
= control target key start
LH: loop header
LB: loop body
LE: loop exit
PB: predicated region body
PF: predicated region fallthrough
CT: control target
= control target key end

     0   :  { %s2543_s0 = inlined_call_operand.vmem [shape: f32[32,512], index: 0, kind: input, shape index: {}]   ;;  %s2544_s1 = inlined_call_operand.vmem [shape: f32[3,64,16], index: 1, kind: input, shape index: {}]   ;;  %s2545_s2 = inlined_call_operand.vmem [shape: f32[3,64,1], index: 2, kind: input, shape index: {}]   ;;  %s2546_s3 = inlined_call_operand.vmem [shape: f32[3,32,64], index: 3, kind: input, shape index: {}]   ;;  %s2547_s4 = inlined_call_operand.vmem [shape: f32[3,32,1], index: 4, kind: input, shape index: {}]   ;;  %s2548_s5 = inlined_call_operand.hbm [shape: f32[32,512], index: 5, kind: output, shape index: {0}]   ;;  %s2549_s6 = inlined_call_operand.hbm [shape: f32[1,512], index: 6, kind: output, shape index: {1}]   ;;  %s2550_s7 = inlined_call_operand.hbm [shape: f32[1,512], index: 7, kind: output, shape index: {2}]  }
   0x1   :  { %2553 = sst [smem:[#allocation10_spill]] %s2543_s0 }
   0x2   :  { %2554 = sst [smem:[#allocation11_spill]] %s2544_s1 }
   0x3   :  { %13 = vsyncpa [#allocation4], 0 }
   0x4   :  { %15 = vsyncpa [#allocation4 + $0x1], 0 }
   0x5   :  { %16 = vsyncpa [#allocation6], 0 }
   0x6   :  { %18 = vsyncpa [#allocation6 + $0x1], 0  ;;  %s2063_s24 = smov 0   ;;  %s2065_s25 = smov 0  }
   0x7   :  { %s2067_s26 = smov 0   ;;  %s2069_s27 = smov 0  }
   0x8 LB: > { %s2084_s28 = sadd.s32 4294967295, %s2014_s27   ;;  %s2551_s29 = sadd.s32 4294967294, %s2014_s27   ;;  %s2014_s27 = sphi %s2069_s27, %s2564_s27   ;;  %s2010_s26 = sphi %s2067_s26, %s2563_s26   ;;  %s2006_s25 = sphi %s2065_s25, %s2562_s25   ;;  %s2002_s24 = sphi %s2063_s24, %s2561_s24  }
   0x9   : > { %s2088_s30 = sadd.s32 1, %s2014_s27   ;;  %s31_s8 = sadd.s32 1, %s2010_s26 }
   0xa   : > { %s28_s9 = ssub.s32 %s2014_s27, %s2088_s30  ;;  %p38_p0 = scmp.ne.s32.totalorder %s2010_s26, %s2006_s25 }
   0xb   : > { %p29_p1 = scmp.eq.s32.totalorder %s28_s9, 0  ;;  %p39_p2 = scmp.eq.s32.totalorder %s2014_s27, 0 }
   0xc   : > { %p152_p3 = scmp.eq.s32.totalorder %s2084_s28, 3  ;;  %p157_p4 = scmp.ne.s32.totalorder %s2006_s25, %s2002_s24 }
   0xd   : > { %s2100_s10 = scalar_select %p29_p1, %s2010_s26, %s31_s8  }
   0xe   : > { %p40_p5 = por %p39_p2, %p38_p0  ;;  %p2102_p6 = por %p152_p3, %p38_p0 }
   0xf   : > { %p158_p7 = scmp.eq.s32.totalorder %s2551_s29, 3  ;;  %p1543_p9 = scmp.ge.s32.totalorder %s2014_s27, 4 }
  0x11   : > { %p2108_p8 = por %p158_p7, %p157_p4  ;;  %238 = sbr.rel (%p1543_p9) target bundleno = 36 (0x24), region = 32 }
  0x16   : > { %241 = sbr.rel (!%p40_p5) target bundleno = 36 (0x24), region = 36  ;;  %s243_s13 = sand.u32 (%p40_p5), 1, %s2010_s26  }
  0x17   : > { %s1545_s14 = sshll.u32 (%p40_p5), %s2014_s27, 3  ;;  %s1544_s15 = sshll.u32 (%p40_p5), %s243_s13, 5 }
  0x18   : > { %s2557_s0 = sld [smem:[#allocation10_spill]] (%p40_p5)  ;;  %s245_s19 = scalar_lea.vmem (%p40_p5), [#allocation2], %s1544_s15 }
  0x1e   : > { %s247_s18 = scalar_lea.vmem %s2557_s0, %s1545_s14 }
  0x1f   : > { %v282_v0 = vld [vmem:[%s247_s18] sm:$0xff] }
  0x20   : > { %v284_v1 = vld [vmem:[%s247_s18 + $0x20] sm:$0xff]  ;;  %283 = vst [vmem:[%s245_s19] sm:$0xff] %v282_v0 }
  0x21   : > { %v286_v2 = vld [vmem:[%s247_s18 + $0x40] sm:$0xff]  ;;  %285 = vst [vmem:[%s245_s19 + $0x8] sm:$0xff] %v284_v1 }
  0x22   : > { %287 = vst [vmem:[%s245_s19 + $0x10] sm:$0xff] %v286_v2  ;;  %v288_v3 = vld [vmem:[%s247_s18 + $0x60] sm:$0xff] }
  0x23   : > { %289 = vst [vmem:[%s245_s19 + $0x18] sm:$0xff] %v288_v3 }
  0x24 PF: > { %p1546_p10 = scmp.ge.s32.totalorder %s2014_s27, 1  ;;  %p294_p11 = scmp.lt.s32.totalorder %s2014_s27, 5 }
  0x26   : > { %p295_p12 = pnand %p1546_p10, %p294_p11 }
  0x27   : > { %s2121_s20 = sand.u32 (!%p295_p12), 1, %s2006_s25   ;;  %s2558_s1 = sld [smem:[#allocation11_spill]] (!%p295_p12) }
  0x28   : > { %298 = sbr.rel (%p295_p12) target bundleno = 1047 (0x417), region = 74  ;;  %s1547_s23 = sshll.u32 (!%p295_p12), %s2121_s20, 5 }
  0x29   : > { %s2133_s13 = scalar_lea.vmem (!%p295_p12), [#allocation2], %s1547_s23  ;;  %s2310_s18 = scalar_lea.vmem (!%p295_p12), [#allocation3], %s1547_s23 }
  0x2a   : > { %s1378_s23 = sand.u32 (!%p295_p12), 1, %s2084_s28   ;;  %s2552_s21 = sshll.u32 (!%p295_p12), %s2084_s28, 4 }
  0x2b   : > { %s333_s22 = scalar_lea.vmem (!%p295_p12), [#allocation5], %s2121_s20  ;;  %s1394_s9 = sshll.u32 (!%p295_p12), %s2310_s18, 4  ;;  %s2444_s9 = int_to_ptr.vmem [resolvable:$true] %s1394_s9 }
  0x2c   : > { %s1410_s8 = sshll.u32 (!%p295_p12), %s333_s22, 4  ;;  %s1634_s14 = sshll.u32 (!%p295_p12), %s2084_s28, 7  ;;  %s2442_s8 = int_to_ptr.vmem [resolvable:$true] %s1410_s8 }
  0x2d   : > { %v344_v4 = vld [vmem:[%s2558_s1] sm:$0xff]  ;;  %vm400_vm0 = vcmask 130048   ;;  %v2016_v5 = vmov 0   ;;  %v359_v6 = vld [vmem:[%s2545_s2 + $0x38] sm:$0xff]  ;;  %v2136_v7 = vld [vmem:[%s2133_s13 + $0x8] sm:$0xff]  ;;  %vm566_vm1 = vcmask 523264   ;;  %s2440_s17 = scalar_lea.hbm %s2549_s6, %s2552_s21  ;;  %s2450_s15 = scalar_lea.hbm %s2548_s5, %s1634_s14 }
  0x2e   : > { %1709 = vmatprep.mubr.msk.f32.mxu0 %vm400_vm0, %v344_v4  ;;  %1872 = vset.pattern.permute.xlu0 %v2016_v5  ;;  %v2139_v8 = vld [vmem:[%s2133_s13] sm:$0xff]  ;;  %v358_v9 = vld [vmem:[%s2545_s2 + $0x30] sm:$0xff]  ;;  %v357_v10 = vld [vmem:[%s2545_s2 + $0x28] sm:$0xff]  ;;  %s2452_s16 = scalar_lea.sflag [#allocation6], %s1378_s23  ;;  %s1898_s29 = scalar_lea.vmem %s2442_s8, 16 }
  0x2f   : > { %1873 = vset.pattern.permute.xlu1 %v2016_v5  ;;  %397 = vperm.xlu0 %1872, %v359_v6   ;;  %v345_v11 = vld [vmem:[%s2558_s1 + $0x8] sm:$0xff]  ;;  %v346_v12 = vld [vmem:[%s2558_s1 + $0x10] sm:$0xff]  ;;  %v356_v13 = vld [vmem:[%s2545_s2 + $0x20] sm:$0xff]  ;;  %p1899_p13 = scmp.ne.s32.totalorder %s2442_s8, %s1898_s29  ;;  %s2017_s21 = smov [#allocation5]  }
  0x30   : > { %1705 = vmatprep.subr.mxu0 %v2136_v7  ;;  %387 = vperm.xlu1 %1873, %v357_v10   ;;  %v355_v14 = vld [vmem:[%s2545_s2 + $0x18] sm:$0xff]  ;;  %v348_v16 = vld [vmem:[%s2558_s1 + $0x20] sm:$0xff]  ;;  %v354_v17 = vld [vmem:[%s2545_s2 + $0x10] sm:$0xff]  ;;  %s1902_s0 = sshll.u32 %s2017_s21, 4  ;;  %s1903_s0 = int_to_ptr.vmem [resolvable:$false] %s1902_s0 }
  0x31   : > { %1706 = vmatpush3.msra.mxu0 %v2136_v7  ;;  %v347_v15 = vld [vmem:[%s2558_s1 + $0x18] sm:$0xff]  ;;  %v353_v18 = vld [vmem:[%s2545_s2 + $0x8] sm:$0xff]  ;;  %v350_v20 = vld [vmem:[%s2558_s1 + $0x30] sm:$0xff]  ;;  %p1900_p0 = pnand %p1899_p13, %p2102_p6  ;;  %p1905_p2 = scmp.lt.s32.totalorder %s2442_s8, %s1903_s0 }
  0x32   : > { %1707 = vmatprep.subr.mxu0 %v2139_v8  ;;  %v349_v19 = vld [vmem:[%s2558_s1 + $0x28] sm:$0xff]  ;;  %v352_v21 = vld [vmem:[%s2545_s2] sm:$0xff]  ;;  %v351_v23 = vld [vmem:[%s2558_s1 + $0x38] sm:$0xff] }
  0x33   : > { %1708 = vmatpush3.msra.mxu0 %v2139_v8  ;;  %392 = vperm.xlu0 %1872, %v358_v9   ;;  %v543_v22 = vld [vmem:[%s2547_s4 + $0x8] sm:$0xff]  ;;  %v542_v24 = vld [vmem:[%s2547_s4] sm:$0xff]  ;;  %v545_v25 = vld [vmem:[%s2547_s4 + $0x18] sm:$0xff]  ;;  %p1901_p1 = pneg %p1900_p0 }
  0x34   : > { %1710 = vmatmul.mubr.msk.f32.vlgmr.msra.gmra.mxu0 %vm400_vm0, %v345_v11  ;;  %382 = vperm.xlu1 %1873, %v356_v13   ;;  %v544_v26 = vld [vmem:[%s2547_s4 + $0x10] sm:$0xff]  ;;  %v1576_v27 = vld [vmem:[%s2545_s2 + $0x78] sm:$0xff]  ;;  %v1574_v29 = vld [vmem:[%s2545_s2 + $0x68] sm:$0xff] }
  0x35   : > { %1712 = vmatprep.mubr.msk.f32.mxu0 %vm400_vm0, %v346_v12  ;;  %v1575_v28 = vld [vmem:[%s2545_s2 + $0x70] sm:$0xff]  ;;  %v1573_v30 = vld [vmem:[%s2545_s2 + $0x60] sm:$0xff]  ;;  %v1572_v31 = vld [vmem:[%s2545_s2 + $0x58] sm:$0xff] }
  0x36   : > { %v1571_v32 = vld [vmem:[%s2545_s2 + $0x50] sm:$0xff]  ;;  %v1570_v33 = vld [vmem:[%s2545_s2 + $0x48] sm:$0xff]  ;;  %v1569_v34 = vld [vmem:[%s2545_s2 + $0x40] sm:$0xff] }
  0x37   : > { %377 = vperm.xlu0 %1872, %v355_v14   ;;  %v1612_v35 = vld [vmem:[%s2545_s2 + $0xb8] sm:$0xff]  ;;  %v1611_v36 = vld [vmem:[%s2545_s2 + $0xb0] sm:$0xff]  ;;  %v1610_v37 = vld [vmem:[%s2545_s2 + $0xa8] sm:$0xff] }
  0x38   : > { %1713 = vmatmul.mubr.msk.f32.gmra.mxu0 %vm400_vm0, %v347_v15  ;;  %372 = vperm.xlu1 %1873, %v354_v17   ;;  %v1609_v38 = vld [vmem:[%s2545_s2 + $0xa0] sm:$0xff]  ;;  %v1608_v39 = vld [vmem:[%s2545_s2 + $0x98] sm:$0xff]  ;;  %v1607_v40 = vld [vmem:[%s2545_s2 + $0x90] sm:$0xff] }
  0x39   : > { %1715 = vmatprep.mubr.msk.f32.mxu0 %vm400_vm0, %v348_v16  ;;  %v1606_v41 = vld [vmem:[%s2545_s2 + $0x88] sm:$0xff]  ;;  %v1605_v42 = vld [vmem:[%s2545_s2 + $0x80] sm:$0xff]  ;;  %v1591_v47 = vld [vmem:[%s2547_s4 + $0x30] sm:$0xff] }
  0x3a   : > { %v1589_v43 = vld [vmem:[%s2547_s4 + $0x20] sm:$0xff]  ;;  %v1590_v44 = vld [vmem:[%s2547_s4 + $0x28] sm:$0xff]  ;;  %v1592_v48 = vld [vmem:[%s2547_s4 + $0x38] sm:$0xff] }
  0x3b   : > { %367 = vperm.xlu0 %1872, %v353_v18   ;;  %v1625_v45 = vld [vmem:[%s2547_s4 + $0x40] sm:$0xff]  ;;  %v1626_v46 = vld [vmem:[%s2547_s4 + $0x48] sm:$0xff]  ;;  %v1627_v49 = vld [vmem:[%s2547_s4 + $0x50] sm:$0xff] }
  0x3c   : > { %1716 = vmatmul.mubr.msk.f32.gmra.mxu0 %vm400_vm0, %v349_v19  ;;  %362 = vperm.xlu1 %1873, %v352_v21   ;;  %v1628_v50 = vld [vmem:[%s2547_s4 + $0x58] sm:$0xff]  ;;  %v538_v51 = vld [vmem:[%s2546_s3] sm:$0xff] }
  0x3d   : > { %1718 = vmatprep.mubr.msk.f32.mxu0 %vm400_vm0, %v350_v20  ;;  %1737 = vmatprep.mubr.msk.f32.mxu1 %vm566_vm1, %v538_v51  ;;  %v1563_v51 = vld [vmem:[%s2558_s1 + $0x50] sm:$0xff] }
  0x3f   : > { %553 = vperm.xlu0 %1872, %v543_v22   ;;  %v539_v22 = vld [vmem:[%s2546_s3 + $0x8] sm:$0xff] }
  0x40   : > { %1719 = vmatmul.mubr.msk.f32.gmra.mxu0 %vm400_vm0, %v351_v23  ;;  %548 = vperm.xlu1 %1873, %v542_v24   ;;  %v540_v23 = vld [vmem:[%s2546_s3 + $0x10] sm:$0xff]  ;;  %v541_v24 = vld [vmem:[%s2546_s3 + $0x18] sm:$0xff] }
  0x43   : > { %563 = vperm.xlu0 %1872, %v545_v25   ;;  %v1561_v25 = vld [vmem:[%s2558_s1 + $0x40] sm:$0xff] }
  0x44   : > { %558 = vperm.xlu1 %1873, %v544_v26   ;;  %1747 = vmatprep.mubr.msk.f32.mxu0 %vm400_vm0, %v1561_v25 }
  0x47   : > { %731 = vperm.xlu0 %1872, %v1576_v27  }
  0x48   : > { %726 = vperm.xlu1 %1873, %v1575_v28  }
  0x4b   : > { %721 = vperm.xlu0 %1872, %v1574_v29  }
  0x4c   : > { %716 = vperm.xlu1 %1873, %v1573_v30  }
  0x4f   : > { %711 = vperm.xlu0 %1872, %v1572_v31  }
  0x50   : > { %706 = vperm.xlu1 %1873, %v1571_v32  }
  0x53   : > { %701 = vperm.xlu0 %1872, %v1570_v33  }
  0x54   : > { %696 = vperm.xlu1 %1873, %v1569_v34  }
  0x57   : > { %1065 = vperm.xlu0 %1872, %v1612_v35  }
  0x58   : > { %1060 = vperm.xlu1 %1873, %v1611_v36  }
  0x5b   : > { %1055 = vperm.xlu0 %1872, %v1610_v37   ;;  %v343_v37 = vld [vmem:[%s2133_s13 + $0x18] sm:$0xff] }
  0x5c   : > { %1050 = vperm.xlu1 %1873, %v1609_v38  }
  0x5f   : > { %1045 = vperm.xlu0 %1872, %v1608_v39  }
  0x60   : > { %1040 = vperm.xlu1 %1873, %v1607_v40   ;;  %v342_v40 = vld [vmem:[%s2133_s13 + $0x10] sm:$0xff] }
  0x63   : > { %1035 = vperm.xlu0 %1872, %v1606_v41  }
  0x64   : > { %1030 = vperm.xlu1 %1873, %v1605_v42  }
  0x67   : > { %883 = vperm.xlu0 %1872, %v1589_v43  }
  0x68   : > { %888 = vperm.xlu1 %1873, %v1590_v44  }
  0x6b   : > { %1217 = vperm.xlu0 %1872, %v1625_v45  }
  0x6c   : > { %1222 = vperm.xlu1 %1873, %v1626_v46  }
  0x6f   : > { %893 = vperm.xlu0 %1872, %v1591_v47  }
  0x70   : > { %898 = vperm.xlu1 %1873, %v1592_v48  }
  0x73   : > { %1227 = vperm.xlu0 %1872, %v1627_v49  }
  0x74   : > { %1232 = vperm.xlu1 %1873, %v1628_v50   ;;  %v1562_v50 = vld [vmem:[%s2558_s1 + $0x48] sm:$0xff] }
  0xaa   : > { %v398_v54 = vpop.permute.xlu0 %397 }
  0xab   : > { %v388_v56 = vpop.permute.xlu1 %387 }
  0xae   : > { %v393_v59 = vpop.permute.xlu0 %392 }
  0xaf   : > { %v383_v61 = vpop.permute.xlu1 %382 }
  0xb2   : > { %v378_v4 = vpop.permute.xlu0 %377 }
  0xb3   : > { %v373_v9 = vpop.permute.xlu1 %372 }
  0xb6   : > { %v368_v14 = vpop.permute.xlu0 %367 }
  0xb7   : > { %v363_v17 = vpop.permute.xlu1 %362 }
  0xba   : > { %v554_v26 = vpop.permute.xlu0 %553 }
  0xbb   : > { %v549_v29 = vpop.permute.xlu1 %548 }
  0xbe   : > { %v564_v39 = vpop.permute.xlu0 %563 }
  0xbf   : > { %v559_v45 = vpop.permute.xlu1 %558 }
  0xf4   : > { %v1711_v52 = vpop.f32.mrf.mxu0 }
  0xf5   : > { %v497_v15 = vadd.f32 %v1711_v52, %v368_v14  ;;  %v1564_v52 = vld [vmem:[%s2558_s1 + $0x58] sm:$0xff] }
  0xf6   : > { %v491_v53 = vpop.f32.mrf.mxu0 }
  0xf7   : > { %v492_v18 = vadd.f32 %v491_v53, %v363_v17  ;;  %v531_v20 = vmax.f32 %v497_v15, 0.0  ;;  %v1565_v53 = vld [vmem:[%s2558_s1 + $0x60] sm:$0xff] }
  0xf8   : > { %v1714_v55 = vpop.f32.mrf.mxu0 }
  0xf9   : > { %v507_v10 = vadd.f32 %v1714_v55, %v378_v4  ;;  %v530_v21 = vmax.f32 %v492_v18, 0.0  ;;  %v1567_v55 = vld [vmem:[%s2558_s1 + $0x70] sm:$0xff] }
  0xfa   : > { %v501_v57 = vpop.f32.mrf.mxu0 }
  0xfb   : > { %v502_v12 = vadd.f32 %v501_v57, %v373_v9  ;;  %v533_v16 = vmax.f32 %v507_v10, 0.0  ;;  %v1597_v57 = vld [vmem:[%s2558_s1 + $0x80] sm:$0xff] }
  0xfc   : > { %v1717_v58 = vpop.f32.mrf.mxu0 }
  0xfd   : > { %v517_v1 = vadd.f32 %v1717_v58, %v388_v56  ;;  %v532_v19 = vmax.f32 %v502_v12, 0.0  ;;  %v1568_v56 = vld [vmem:[%s2558_s1 + $0x78] sm:$0xff]  ;;  %v1598_v58 = vld [vmem:[%s2558_s1 + $0x88] sm:$0xff] }
  0xfe   : > { %v511_v60 = vpop.f32.mrf.mxu0 }
  0xff   : > { %v512_v5 = vadd.f32 %v511_v60, %v383_v61  ;;  %v535_v11 = vmax.f32 %v517_v1, 0.0  ;;  %v1600_v60 = vld [vmem:[%s2558_s1 + $0x98] sm:$0xff]  ;;  %v1601_v61 = vld [vmem:[%s2558_s1 + $0xa0] sm:$0xff] }
 0x100   : > { %v1720_v62 = vpop.f32.mrf.mxu0  ;;  %v1585_v1 = vld [vmem:[%s2546_s3 + $0x20] sm:$0xff] }
 0x101   : > { %v527_v63 = vadd.f32 %v1720_v62, %v398_v54  ;;  %v534_v13 = vmax.f32 %v512_v5, 0.0  ;;  %v1566_v54 = vld [vmem:[%s2558_s1 + $0x68] sm:$0xff] }
 0x102   : > { %v521_v0 = vpop.f32.mrf.mxu0  ;;  %v1602_v62 = vld [vmem:[%s2558_s1 + $0xa8] sm:$0xff] }
 0x103   : > { %v537_v2 = vmax.f32 %v527_v63, 0.0  ;;  %v522_v3 = vadd.f32 %v521_v0, %v393_v59  ;;  %v1599_v59 = vld [vmem:[%s2558_s1 + $0x90] sm:$0xff]  ;;  %v1604_v0 = vld [vmem:[%s2558_s1 + $0xb8] sm:$0xff] }
 0x104   : > { %v1603_v63 = vld [vmem:[%s2558_s1 + $0xb0] sm:$0xff]  ;;  %s1904_s1 = scalar_lea.vmem %s1903_s0, 32 }
 0x105   : > { %v536_v6 = vmax.f32 %v522_v3, 0.0  ;;  %1721 = vmatprep.subr.mxu1 %v537_v2  ;;  %v727_v3 = vpop.permute.xlu1 %726  ;;  %p1906_p3 = scmp.lt.s32.totalorder %s1904_s1, %s1898_s29 }
 0x106   : > { %1722 = vmatpush3.msra.mxu1 %v537_v2  ;;  %v732_v2 = vpop.permute.xlu0 %731 }
 0x107   : > { %1723 = vmatprep.subr.mxu1 %v536_v6  ;;  %p1907_p4 = por %p1906_p3, %p1905_p2 }
 0x108   : > { %1724 = vmatpush3.msra.mxu1 %v536_v6 }
 0x109   : > { %1725 = vmatprep.subr.mxu1 %v535_v11  ;;  %v717_v9 = vpop.permute.xlu1 %716  ;;  %p1908_p5 = pnand %p1907_p4, %p1901_p1 }
 0x10a   : > { %1726 = vmatpush3.msra.mxu1 %v535_v11  ;;  %v722_v5 = vpop.permute.xlu0 %721 }
 0x10b   : > { %1727 = vmatprep.subr.mxu1 %v534_v13 }
 0x10c   : > { %1728 = vmatpush3.msra.mxu1 %v534_v13 }
 0x10d   : > { %1729 = vmatprep.subr.mxu1 %v533_v16  ;;  %v707_v14 = vpop.permute.xlu1 %706 }
 0x10e   : > { %1730 = vmatpush3.msra.mxu1 %v533_v16  ;;  %v712_v12 = vpop.permute.xlu0 %711 }
 0x10f   : > { %1731 = vmatprep.subr.mxu1 %v532_v19 }
 0x110   : > { %1732 = vmatpush3.msra.mxu1 %v532_v19 }
 0x111   : > { %1733 = vmatprep.subr.mxu1 %v531_v20 }
 0x112   : > { %1734 = vmatpush3.msra.mxu1 %v531_v20  ;;  %v702_v18 = vpop.permute.xlu0 %701 }
 0x113   : > { %1735 = vmatprep.subr.mxu1 %v530_v21 }
 0x114   : > { %1736 = vmatpush3.msra.mxu1 %v530_v21 }
 0x115   : > { %1738 = vmatmul.mubr.msk.f32.vlgmr.msra.gmra.mxu1 %vm566_vm1, %v539_v22 }
 0x116   : > { %1740 = vmatprep.mubr.msk.f32.mxu1 %vm566_vm1, %v540_v23  ;;  %v697_v23 = vpop.permute.xlu1 %696 }
 0x119   : > { %1741 = vmatmul.mubr.msk.f32.gmra.mxu1 %vm566_vm1, %v541_v24 }
 0x11a   : > { %1775 = vmatprep.mubr.msk.f32.mxu1 %vm566_vm1, %v1585_v1  ;;  %v1621_v1 = vld [vmem:[%s2546_s3 + $0x40] sm:$0xff] }
 0x1d5   : > { %v1739_v27 = vpop.f32.mrf.mxu1 }
 0x1d6   : > { %v651_v28 = vadd.f32 %v1739_v27, %v554_v26 }
 0x1d7   : > { %v645_v30 = vpop.f32.mrf.mxu1 }
 0x1d8   : > { %1874 = vtanh.f32 %v651_v28  ;;  %v646_v31 = vadd.f32 %v645_v30, %v549_v29  ;;  %v1066_v30 = vpop.permute.xlu0 %1065 }
 0x1d9   : > { %v1742_v36 = vpop.f32.mrf.mxu1 }
 0x1da   : > { %1876 = vtanh.f32 %v646_v31  ;;  %v661_v42 = vadd.f32 %v1742_v36, %v564_v39  ;;  %v1061_v36 = vpop.permute.xlu1 %1060 }
 0x1db   : > { %v655_v41 = vpop.f32.mrf.mxu1 }
 0x1dc   : > { %v656_v47 = vadd.f32 %v655_v41, %v559_v45 }
 0x1e5   : > { %v2298_v32 = vpop.eup %1874 }
 0x1e6   : > { %v668_v33 = vmul.f32 1.442695, %v2298_v32 }
 0x1e7   : > { %v2301_v34 = vpop.eup %1876 }
 0x1e8   : > { %1878 = vpow2.f32 %v668_v33  ;;  %v666_v35 = vmul.f32 1.442695, %v2301_v34 }
 0x1ea   : > { %1880 = vpow2.f32 %v666_v35 }
 0x1f5   : > { %v1879_v38 = vpop.eup %1878 }
 0x1f6   : > { %v671_v43 = vmul.f32 %v1879_v38, %v343_v37 }
 0x1f7   : > { %v1881_v44 = vpop.eup %1880 }
 0x1f8   : > { %v2306_v46 = vadd.f32 %v671_v43, %v661_v42  ;;  %v670_v48 = vmul.f32 %v1881_v44, %v342_v40  ;;  %v1056_v43 = vpop.permute.xlu0 %1055 }
 0x1fa   : > { %1370 = vst [vmem:[%s2310_s18 + $0x8] sm:$0xff] %v2306_v46  ;;  %v2314_v49 = vadd.f32 %v670_v48, %v656_v47  ;;  %1743 = vmatprep.subr.mxu0 %v2306_v46  ;;  %v1051_v47 = vpop.permute.xlu1 %1050 }
 0x1fb   : > { %1744 = vmatpush3.msra.mxu0 %v2306_v46 }
 0x1fc   : > { %1369 = vst [vmem:[%s2310_s18] sm:$0xff] %v2314_v49  ;;  %1745 = vmatprep.subr.mxu0 %v2314_v49 }
 0x1fd   : > { %1746 = vmatpush3.msra.mxu0 %v2314_v49 }
 0x1fe   : > { %1748 = vmatmul.mubr.msk.f32.vlgmr.msra.gmra.mxu0 %vm400_vm0, %v1562_v50  ;;  %1781 = vmatprep.subr.mxu0 %v2306_v46 }
 0x1ff   : > { %1782 = vmatpush3.msra.mxu0 %v2306_v46  ;;  %1750 = vmatprep.mubr.msk.f32.mxu0 %vm400_vm0, %v1563_v51 }
 0x200   : > { %1783 = vmatprep.subr.mxu0 %v2314_v49 }
 0x201   : > { %1784 = vmatpush3.msra.mxu0 %v2314_v49 }
 0x202   : > { %1751 = vmatmul.mubr.msk.f32.gmra.mxu0 %vm400_vm0, %v1564_v52 }
 0x203   : > { %1753 = vmatprep.mubr.msk.f32.mxu0 %vm400_vm0, %v1565_v53  ;;  %v1586_v53 = vld [vmem:[%s2546_s3 + $0x28] sm:$0xff] }
 0x206   : > { %1754 = vmatmul.mubr.msk.f32.gmra.mxu0 %vm400_vm0, %v1566_v54 }
 0x207   : > { %1756 = vmatprep.mubr.msk.f32.mxu0 %vm400_vm0, %v1567_v55 }
 0x20a   : > { %1757 = vmatmul.mubr.msk.f32.gmra.mxu0 %vm400_vm0, %v1568_v56 }
 0x20b   : > { %1785 = vmatprep.mubr.msk.f32.mxu0 %vm400_vm0, %v1597_v57  ;;  %v1587_v57 = vld [vmem:[%s2546_s3 + $0x30] sm:$0xff] }
 0x20e   : > { %1786 = vmatmul.mubr.msk.f32.vlgmr.msra.gmra.mxu0 %vm400_vm0, %v1598_v58  ;;  %v1046_v58 = vpop.permute.xlu0 %1045 }
 0x20f   : > { %1788 = vmatprep.mubr.msk.f32.mxu0 %vm400_vm0, %v1599_v59 }
 0x212   : > { %1789 = vmatmul.mubr.msk.f32.gmra.mxu0 %vm400_vm0, %v1600_v60 }
 0x213   : > { %1791 = vmatprep.mubr.msk.f32.mxu0 %vm400_vm0, %v1601_v61  ;;  %v1041_v61 = vpop.permute.xlu1 %1040 }
 0x216   : > { %1792 = vmatmul.mubr.msk.f32.gmra.mxu0 %vm400_vm0, %v1602_v62  ;;  %v1588_v62 = vld [vmem:[%s2546_s3 + $0x38] sm:$0xff] }
 0x217   : > { %1794 = vmatprep.mubr.msk.f32.mxu0 %vm400_vm0, %v1603_v63 }
 0x21a   : > { %1795 = vmatmul.mubr.msk.f32.gmra.mxu0 %vm400_vm0, %v1604_v0 }
 0x2be   : > { %v1749_v4 = vpop.f32.mrf.mxu0 }
 0x2bf   : > { %v830_v38 = vadd.f32 %v1749_v4, %v702_v18  ;;  %v1036_v4 = vpop.permute.xlu0 %1035 }
 0x2c0   : > { %v824_v6 = vpop.f32.mrf.mxu0 }
 0x2c1   : > { %v825_v41 = vadd.f32 %v824_v6, %v697_v23  ;;  %v864_v45 = vmax.f32 %v830_v38, 0.0 }
 0x2c2   : > { %v1752_v10 = vpop.f32.mrf.mxu0 }
 0x2c3   : > { %v840_v28 = vadd.f32 %v1752_v10, %v712_v12  ;;  %v863_v50 = vmax.f32 %v825_v41, 0.0 }
 0x2c4   : > { %v834_v11 = vpop.f32.mrf.mxu0 }
 0x2c5   : > { %v835_v33 = vadd.f32 %v834_v11, %v707_v14  ;;  %v866_v39 = vmax.f32 %v840_v28, 0.0  ;;  %v1622_v14 = vld [vmem:[%s2546_s3 + $0x48] sm:$0xff] }
 0x2c6   : > { %v1755_v13 = vpop.f32.mrf.mxu0 }
 0x2c7   : > { %v850_v20 = vadd.f32 %v1755_v13, %v722_v5  ;;  %v865_v42 = vmax.f32 %v835_v33, 0.0 }
 0x2c8   : > { %v844_v15 = vpop.f32.mrf.mxu0 }
 0x2c9   : > { %v845_v25 = vadd.f32 %v844_v15, %v717_v9  ;;  %v868_v29 = vmax.f32 %v850_v20, 0.0  ;;  %v1031_v9 = vpop.permute.xlu1 %1030  ;;  %v1623_v15 = vld [vmem:[%s2546_s3 + $0x50] sm:$0xff] }
 0x2ca   : > { %v1758_v16 = vpop.f32.mrf.mxu0 }
 0x2cb   : > { %v860_v17 = vadd.f32 %v1758_v16, %v732_v2  ;;  %v867_v35 = vmax.f32 %v845_v25, 0.0  ;;  %v1624_v16 = vld [vmem:[%s2546_s3 + $0x58] sm:$0xff] }
 0x2cc   : > { %v854_v19 = vpop.f32.mrf.mxu0 }
 0x2cd   : > { %v870_v21 = vmax.f32 %v860_v17, 0.0  ;;  %v855_v22 = vadd.f32 %v854_v19, %v727_v3  ;;  %v889_v18 = vpop.permute.xlu1 %888 }
 0x2ce   : > { %v2390_v24 = vpop.f32.mrf.mxu0 }
 0x2cf   : > { %v869_v26 = vmax.f32 %v855_v22, 0.0  ;;  %1759 = vmatprep.subr.mxu1 %v870_v21  ;;  %v1164_v5 = vadd.f32 %v2390_v24, %v1036_v4 }
 0x2d0   : > { %1760 = vmatpush3.msra.mxu1 %v870_v21  ;;  %v2392_v27 = vpop.f32.mrf.mxu0  ;;  %v884_v21 = vpop.permute.xlu0 %883 }
 0x2d1   : > { %1761 = vmatprep.subr.mxu1 %v869_v26  ;;  %v1159_v10 = vadd.f32 %v2392_v27, %v1031_v9  ;;  %v1198_v12 = vmax.f32 %v1164_v5, 0.0  ;;  %v1223_v25 = vpop.permute.xlu1 %1222 }
 0x2d2   : > { %1762 = vmatpush3.msra.mxu1 %v869_v26  ;;  %v1790_v31 = vpop.f32.mrf.mxu0 }
 0x2d3   : > { %1763 = vmatprep.subr.mxu1 %v868_v29  ;;  %v1174_v63 = vadd.f32 %v1790_v31, %v1046_v58  ;;  %v1197_v13 = vmax.f32 %v1159_v10, 0.0 }
 0x2d4   : > { %1764 = vmatpush3.msra.mxu1 %v868_v29  ;;  %v1168_v37 = vpop.f32.mrf.mxu0  ;;  %v1218_v28 = vpop.permute.xlu0 %1217 }
 0x2d5   : > { %1765 = vmatprep.subr.mxu1 %v867_v35  ;;  %v1169_v2 = vadd.f32 %v1168_v37, %v1041_v61  ;;  %v1200_v6 = vmax.f32 %v1174_v63, 0.0 }
 0x2d6   : > { %1766 = vmatpush3.msra.mxu1 %v867_v35  ;;  %v1793_v40 = vpop.f32.mrf.mxu0 }
 0x2d7   : > { %1767 = vmatprep.subr.mxu1 %v866_v39  ;;  %v1184_v54 = vadd.f32 %v1793_v40, %v1056_v43  ;;  %v1199_v11 = vmax.f32 %v1169_v2, 0.0 }
 0x2d8   : > { %1768 = vmatpush3.msra.mxu1 %v866_v39  ;;  %v1178_v44 = vpop.f32.mrf.mxu0 }
 0x2d9   : > { %1769 = vmatprep.subr.mxu1 %v865_v42  ;;  %v1179_v59 = vadd.f32 %v1178_v44, %v1051_v47  ;;  %v1202_v0 = vmax.f32 %v1184_v54, 0.0 }
 0x2da   : > { %1770 = vmatpush3.msra.mxu1 %v865_v42  ;;  %v1796_v48 = vpop.f32.mrf.mxu0 }
 0x2db   : > { %v1194_v51 = vadd.f32 %v1796_v48, %v1066_v30  ;;  %1771 = vmatprep.subr.mxu1 %v864_v45  ;;  %v1201_v3 = vmax.f32 %v1179_v59, 0.0 }
 0x2dc   : > { %1772 = vmatpush3.msra.mxu1 %v864_v45  ;;  %v1188_v52 = vpop.f32.mrf.mxu0 }
 0x2dd   : > { %v1204_v55 = vmax.f32 %v1194_v51, 0.0  ;;  %v1189_v56 = vadd.f32 %v1188_v52, %v1061_v36  ;;  %1773 = vmatprep.subr.mxu1 %v863_v50  ;;  %v899_v52 = vpop.permute.xlu1 %898 }
 0x2de   : > { %1774 = vmatpush3.msra.mxu1 %v863_v50 }
 0x2df   : > { %v1203_v60 = vmax.f32 %v1189_v56, 0.0  ;;  %1776 = vmatmul.mubr.msk.f32.vlgmr.msra.gmra.mxu1 %vm566_vm1, %v1586_v53  ;;  %1797 = vmatprep.subr.mxu1 %v1204_v55  ;;  %v894_v53 = vpop.permute.xlu0 %893 }
 0x2e0   : > { %1798 = vmatpush3.msra.mxu1 %v1204_v55  ;;  %1778 = vmatprep.mubr.msk.f32.mxu1 %vm566_vm1, %v1587_v57 }
 0x2e1   : > { %1799 = vmatprep.subr.mxu1 %v1203_v60 }
 0x2e2   : > { %1800 = vmatpush3.msra.mxu1 %v1203_v60 }
 0x2e3   : > { %1779 = vmatmul.mubr.msk.f32.gmra.mxu1 %vm566_vm1, %v1588_v62  ;;  %1801 = vmatprep.subr.mxu1 %v1202_v0  ;;  %v1233_v62 = vpop.permute.xlu1 %1232 }
 0x2e4   : > { %1802 = vmatpush3.msra.mxu1 %v1202_v0  ;;  %1813 = vmatprep.mubr.msk.f32.mxu1 %vm566_vm1, %v1621_v1 }
 0x2e5   : > { %1803 = vmatprep.subr.mxu1 %v1201_v3 }
 0x2e6   : > { %1804 = vmatpush3.msra.mxu1 %v1201_v3  ;;  %v1228_v3 = vpop.permute.xlu0 %1227 }
 0x2e7   : > { %1805 = vmatprep.subr.mxu1 %v1200_v6 }
 0x2e8   : > { %1806 = vmatpush3.msra.mxu1 %v1200_v6 }
 0x2e9   : > { %1807 = vmatprep.subr.mxu1 %v1199_v11 }
 0x2ea   : > { %1808 = vmatpush3.msra.mxu1 %v1199_v11 }
 0x2eb   : > { %1809 = vmatprep.subr.mxu1 %v1198_v12 }
 0x2ec   : > { %1810 = vmatpush3.msra.mxu1 %v1198_v12 }
 0x2ed   : > { %1811 = vmatprep.subr.mxu1 %v1197_v13 }
 0x2ee   : > { %1812 = vmatpush3.msra.mxu1 %v1197_v13 }
 0x2ef   : > { %1814 = vmatmul.mubr.msk.f32.vlgmr.msra.gmra.mxu1 %vm566_vm1, %v1622_v14 }
 0x2f0   : > { %1816 = vmatprep.mubr.msk.f32.mxu1 %vm566_vm1, %v1623_v15 }
 0x2f3   : > { %1817 = vmatmul.mubr.msk.f32.gmra.mxu1 %vm566_vm1, %v1624_v16 }
 0x39f   : > { %v1777_v17 = vpop.f32.mrf.mxu1 }
 0x3a0   : > { %v985_v20 = vadd.f32 %v1777_v17, %v889_v18 }
 0x3a1   : > { %v979_v19 = vpop.f32.mrf.mxu1 }
 0x3a2   : > { %v980_v22 = vadd.f32 %v979_v19, %v884_v21  ;;  %1882 = vtanh.f32 %v985_v20 }
 0x3a3   : > { %v1780_v23 = vpop.f32.mrf.mxu1 }
 0x3a4   : > { %1884 = vtanh.f32 %v980_v22  ;;  %v995_v55 = vadd.f32 %v1780_v23, %v899_v52 }
 0x3a5   : > { %v989_v24 = vpop.f32.mrf.mxu1 }
 0x3a6   : > { %v990_v59 = vadd.f32 %v989_v24, %v894_v53 }
 0x3af   : > { %v1815_v26 = vpop.f32.mrf.mxu1  ;;  %v1883_v31 = vpop.eup %1882 }
 0x3b0   : > { %v1319_v27 = vadd.f32 %v1815_v26, %v1223_v25  ;;  %v1002_v35 = vmul.f32 1.442695, %v1883_v31  ;;  %v1009_v38 = vadd.f32 %v1883_v31, %v2298_v32 }
 0x3b1   : > { %v1313_v29 = vpop.f32.mrf.mxu1  ;;  %v1885_v33 = vpop.eup %1884 }
 0x3b2   : > { %v1314_v30 = vadd.f32 %v1313_v29, %v1218_v28  ;;  %1886 = vtanh.f32 %v1319_v27  ;;  %v1000_v36 = vmul.f32 1.442695, %v1885_v33  ;;  %v1008_v39 = vadd.f32 %v1885_v33, %v2301_v34 }
 0x3b3   : > { %v1818_v54 = vpop.f32.mrf.mxu1 }
 0x3b4   : > { %1888 = vtanh.f32 %v1314_v30  ;;  %v1329_v0 = vadd.f32 %v1818_v54, %v1233_v62 }
 0x3b5   : > { %1890 = vpow2.f32 %v1002_v35 }
 0x3b6   : > { %1892 = vpow2.f32 %v1000_v36 }
 0x3bf   : > { %v1887_v37 = vpop.eup %1886 }
 0x3c0   : > { %v1336_v40 = vmul.f32 1.442695, %v1887_v37  ;;  %v1343_v44 = vadd.f32 %v1887_v37, %v1009_v38 }
 0x3c1   : > { %v1889_v41 = vpop.eup %1888 }
 0x3c2   : > { %1894 = vpow2.f32 %v1336_v40  ;;  %v1334_v42 = vmul.f32 1.442695, %v1889_v41  ;;  %v1342_v43 = vadd.f32 %v1889_v41, %v1008_v39  ;;  %v1891_v48 = vpop.eup %1890 }
 0x3c3   : > { %v1893_v51 = vpop.eup %1892  ;;  %v1005_v32 = vmul.f32 %v1891_v48, %v2136_v7  ;;  %v1323_v7 = vpop.f32.mrf.mxu1 }
 0x3c4   : > { %1896 = vpow2.f32 %v1334_v42  ;;  %v1344_v45 = vadd.f32 %v1343_v44, %v1342_v43  ;;  %v1004_v56 = vmul.f32 %v1893_v51, %v2139_v8  ;;  %v1324_v5 = vadd.f32 %v1323_v7, %v1228_v3 }
 0x3c5   : > { %v1007_v58 = vadd.f32 %v1005_v32, %v995_v55 }
 0x3c6   : > { %v1345_v47 = vrot.slane %v1344_v45, 4  ;;  %v1006_v63 = vadd.f32 %v1004_v56, %v990_v59 }
 0x3c8   : > { %v1346_v50 = vadd.f32 %v1345_v47, %v1344_v45 }
 0x3ca   : > { %v1347_v34 = vrot.slane %v1346_v50, 2 }
 0x3cc   : > { %v1348_v57 = vadd.f32 %v1347_v34, %v1346_v50 }
 0x3ce   : > { %v1349_v60 = vrot.slane %v1348_v57, 1 }
 0x3cf   : > { %v1895_v61 = vpop.eup %1894 }
 0x3d0   : > { %v1339_v1 = vmul.f32 %v1895_v61, %v1007_v58  ;;  %v2433_v2 = vadd.f32 %v1349_v60, %v1348_v57 }
 0x3d1   : > { %v1897_v8 = vpop.eup %1896 }
 0x3d2   : > { %v1341_v4 = vadd.f32 %v1339_v1, %v1329_v0  ;;  %v1338_v6 = vmul.f32 %v1897_v8, %v1006_v63  ;;  %1364 = vst [vmem:[%s333_s22] sm:$0x1] %v2433_v2 }
 0x3d3   : > { %1911 = shalt.err (!%p1908_p5)
}
 0x3d4   : > { %s1912_s23 = scalar_lea.hbm %s2440_s17, 16  ;;  %s1916_s21 = scalar_lea.hbm %s2549_s6, 64 }
 0x3d5   : > { %p1913_p7 = scmp.ne.s32.totalorder %s2440_s17, %s1912_s23  ;;  %p1917_p11 = scmp.lt.s32.totalorder %s2440_s17, %s2549_s6 }
 0x3d6   : > { %p1918_p12 = scmp.lt.s32.totalorder %s1916_s21, %s1912_s23 }
 0x3d7   : > { %p1914_p9 = pnand %p1913_p7, %p2102_p6 }
 0x3d8   : > { %p1919_p13 = por %p1918_p12, %p1917_p11 }
 0x3d9   : > { %p1915_p10 = pneg %p1914_p9 }
 0x3db   : > { %p1920_p0 = pnand %p1919_p13, %p1915_p10 }
 0x3dd   : > { %1923 = shalt.err (!%p1920_p0)
}
 0x3de   : > { %1820 = dma.vmem_to_hbm [thread:$0]  (%p2102_p6), %s2442_s8, 16, %s2440_s17, %s2452_s16   ;;  %v1354_v9 = vmul.f32 %v1341_v4, %v1341_v4  ;;  %1372 = vst [vmem:[%s2310_s18 + $0x18] sm:$0xff] %v1341_v4  ;;  %v1340_v10 = vadd.f32 %v1338_v6, %v1324_v5  ;;  %v1352_v11 = vmul.f32 %v2306_v46, %v2306_v46  ;;  %v1351_v12 = vmul.f32 %v2314_v49, %v2314_v49 }
 0x3df   : > { %s1374_s0 = scalar_lea.sflag [#allocation4], %s2121_s20  ;;  %s1924_s1 = scalar_lea.vmem %s2444_s9, 512 }
 0x3e0   : > { %v1353_v13 = vmul.f32 %v1340_v10, %v1340_v10  ;;  %1371 = vst [vmem:[%s2310_s18 + $0x10] sm:$0xff] %v1340_v10  ;;  %p1925_p1 = scmp.ne.s32.totalorder %s2444_s9, %s1924_s1  ;;  %s2018_s29 = smov [#allocation3]  }
 0x3e1   : > { %s1928_s8 = sshll.u32 %s2018_s29, 4  ;;  %s1929_s8 = int_to_ptr.vmem [resolvable:$false] %s1928_s8 }
 0x3e2   : > { %p1926_p2 = pnand %p1925_p1, %p2102_p6  ;;  %s1930_s17 = scalar_lea.vmem %s1929_s8, 1024 }
 0x3e3   : > { %p1931_p4 = scmp.lt.s32.totalorder %s2444_s9, %s1929_s8  ;;  %p1932_p5 = scmp.lt.s32.totalorder %s1930_s17, %s1924_s1 }
 0x3e4   : > { %p1927_p3 = pneg %p1926_p2 }
 0x3e5   : > { %p1933_p7 = por %p1932_p5, %p1931_p4 }
 0x3e7   : > { %p1934_p9 = pnand %p1933_p7, %p1927_p3 }
 0x3e9   : > { %1937 = shalt.err (!%p1934_p9)
}
 0x3ea   : > { %s1938_s18 = scalar_lea.hbm %s2450_s15, 512  ;;  %s1942_s14 = scalar_lea.hbm %s2548_s5, 2048 }
 0x3eb   : > { %p1939_p10 = scmp.ne.s32.totalorder %s2450_s15, %s1938_s18  ;;  %p1943_p13 = scmp.lt.s32.totalorder %s2450_s15, %s2548_s5 }
 0x3ec   : > { %p1944_p0 = scmp.lt.s32.totalorder %s1942_s14, %s1938_s18 }
 0x3ed   : > { %p1940_p11 = pnand %p1939_p10, %p2102_p6 }
 0x3ee   : > { %p1945_p1 = por %p1944_p0, %p1943_p13 }
 0x3ef   : > { %p1941_p12 = pneg %p1940_p11 }
 0x3f1   : > { %p1946_p2 = pnand %p1945_p1, %p1941_p12 }
 0x3f3   : > { %1949 = shalt.err (!%p1946_p2)
}
 0x3f4   : > { %s2019_s19 = smov 128   ;;  %s2020_s1 = smov 512   ;;  %v1356_v46 = vadd.f32 %v1354_v9, %v1352_v11  ;;  %v1355_v49 = vadd.f32 %v1353_v13, %v1351_v12 }
 0x3f5   : > { %s2021_s29 = smov 8   ;;  %s339_s8 = scalar_lea.vmem [#allocation7], %s2121_s20 }
 0x3f6   : > { %1819 = dma.vmem_to_hbm [thread:$0]  (%p2102_p6), %s2444_s9, 512, %s2450_s15, %s1374_s0, %s2019_s19, %s2020_s1, %s2021_s29   ;;  %v1357_v14 = vadd.f32 %v1356_v46, %v1355_v49 }
 0x3f7   : > { %s1423_s17 = sshll.u32 %s339_s8, 4  ;;  %s2559_s18 = sshll.u32 %s2084_s28, 4  ;;  %s1424_s17 = int_to_ptr.vmem [resolvable:$true] %s1423_s17 }
 0x3f8   : > { %v1358_v15 = vrot.slane %v1357_v14, 4  ;;  %s1421_s9 = scalar_lea.hbm %s2550_s7, %s2559_s18  ;;  %s1950_s15 = scalar_lea.vmem %s1424_s17, 16 }
 0x3f9   : > { %p1951_p3 = scmp.ne.s32.totalorder %s1424_s17, %s1950_s15  ;;  %s2022_s0 = smov [#allocation7]  }
 0x3fa   : > { %v1359_v16 = vadd.f32 %v1358_v15, %v1357_v14  ;;  %s1954_s14 = sshll.u32 %s2022_s0, 4  ;;  %s1955_s14 = int_to_ptr.vmem [resolvable:$false] %s1954_s14 }
 0x3fb   : > { %p1952_p4 = pnand %p1951_p3, %p2102_p6  ;;  %s1956_s20 = scalar_lea.vmem %s1955_s14, 32 }
 0x3fc   : > { %v1360_v17 = vrot.slane %v1359_v16, 2  ;;  %p1957_p7 = scmp.lt.s32.totalorder %s1424_s17, %s1955_s14  ;;  %p1958_p9 = scmp.lt.s32.totalorder %s1956_s20, %s1950_s15 }
 0x3fd   : > { %p1953_p5 = pneg %p1952_p4 }
 0x3fe   : > { %v1361_v18 = vadd.f32 %v1360_v17, %v1359_v16  ;;  %p1959_p10 = por %p1958_p9, %p1957_p7 }
 0x400   : > { %v1362_v19 = vrot.slane %v1361_v18, 1  ;;  %p1960_p11 = pnand %p1959_p10, %p1953_p5 }
 0x402   : > { %v1363_v20 = vadd.f32 %v1362_v19, %v1361_v18 }
 0x404   : > { %v1365_v21 = vadd.f32 58.812065, %v1363_v20 }
 0x406   : > { %v1366_v22 = vmul.f32 -0.5, %v1365_v21 }
 0x408   : > { %v1367_v23 = vadd.f32 %v1366_v22, %v2433_v2 }
 0x40a   : > { %1368 = vst [vmem:[%s339_s8] sm:$0x1] %v1367_v23 }
 0x40b   : > { %1963 = shalt.err (!%p1960_p11)
}
 0x40c   : > { %s1964_s28 = scalar_lea.hbm %s1421_s9, 16  ;;  %s1968_s19 = scalar_lea.hbm %s2550_s7, 64 }
 0x40d   : > { %p1965_p12 = scmp.ne.s32.totalorder %s1421_s9, %s1964_s28  ;;  %p1969_p1 = scmp.lt.s32.totalorder %s1421_s9, %s2550_s7 }
 0x40e   : > { %p1970_p2 = scmp.lt.s32.totalorder %s1968_s19, %s1964_s28 }
 0x40f   : > { %p1966_p13 = pnand %p1965_p12, %p2102_p6 }
 0x410   : > { %p1971_p3 = por %p1970_p2, %p1969_p1 }
 0x411   : > { %p1967_p0 = pneg %p1966_p13 }
 0x413   : > { %p1972_p4 = pnand %p1971_p3, %p1967_p0 }
 0x415   : > { %1975 = shalt.err (!%p1972_p4)
}
 0x416   : > { %1821 = dma.vmem_to_hbm [thread:$0]  (%p2102_p6), %s1424_s17, 16, %s1421_s9, %s2452_s16  }
 0x417 PF: > { %p1835_p5 = scmp.ge.s32.totalorder %s2014_s27, 2  ;;  %s1435_s8 = sand.u32 1, %s2002_s24  }
 0x418   : > { %s1436_s18 = scalar_lea.sflag [#allocation4], %s1435_s8 }
 0x419   : > { %p1826_p7 = pnand %p1835_p5, %p2108_p8 }
 0x41b   : > { %p1827_p9 = pneg %p1826_p7 }
 0x41d   : > { %1993 = dma.done.wait (%p1827_p9), %s1436_s18, 512  }
 0x41e   : > { %1995 = vsyncadd (%p1827_p9), %s1436_s18, 4294966784  ;;  %s2560_s23 = sadd.s32 4294967294, %s2014_s27  }
 0x41f   : > { %s1444_s22 = sand.u32 1, %s2560_s23  }
 0x420   : > { %s1445_s15 = scalar_lea.sflag [#allocation6], %s1444_s22 }
 0x421   : > { %1997 = dma.done.wait (%p1827_p9), %s1445_s15, 32  }
 0x422   : > { %1999 = vsyncadd (%p1827_p9), %s1445_s15, 4294967264  ;;  %p21_p6 = scmp.ge.s32.totalorder %s2088_s30, 6   ;;  %s2561_s24 = smov %s2006_s25 }
 0x423   : > { %s2562_s25 = smov %s2010_s26  ;;  %s2563_s26 = smov %s2100_s10 }
 0x424   : > { %s2564_s27 = smov %s2088_s30  ;;  %23 = sbr.rel (!%p21_p6) target bundleno = 8 (0x8), region = 158 }
 0x429   :  { %1457 = vsyncpa [#allocation4], 1 }
 0x42a   :  { %1459 = vsyncpa [#allocation4 + $0x1], 1 }
 0x42b   :  { %1460 = vsyncpa [#allocation6], 1 }
 0x42c   :  { %1462 = vsyncpa [#allocation6 + $0x1], 1 }

</bundles_post_ra>
